<compile_context>
chip_gen: v5e
topology: v5e:2x2
jax: 0.10.0
libtpu: 0.0.40
codegen_flags: <defaults>
</compile_context>

<pallas_src>
import functools
import math

import jax
import jax.numpy as jnp
import numpy as np
from jax import lax
from jax.experimental import pallas as pl
from jax.experimental.pallas import tpu as pltpu


def _mha_kernel(q_ref, k_ref, v_ref,
                wq_ref, bq_ref, wk_ref, bk_ref, wv_ref, bv_ref,
                wo_ref, bo_ref,
                *refs, n_heads, emit_attn):
    # q_ref: (1, tq, E) bf16 ; k_ref/v_ref: (1, S, E) bf16 (resident across q tiles)
    # wq/wk/wv/wo: (E, E) bf16 in x@W layout (scale folded into wq/bq)
    # bq/bk/bv/bo: (1, E) f32
    if emit_attn:
        out_ref, attn_ref, k_scr, v_scr = refs
    else:
        out_ref, k_scr, v_scr = refs
        attn_ref = None

    qi = pl.program_id(1)
    H = n_heads
    tq, E = q_ref.shape[1], q_ref.shape[2]
    S = k_ref.shape[1]
    Dh = E // H

    # Project K/V once per batch element (first q tile); reuse from VMEM scratch after.
    @pl.when(qi == 0)
    def _():
        kp = jnp.dot(k_ref[0], wk_ref[...],
                     preferred_element_type=jnp.float32) + bk_ref[...]      # (S, E) f32
        vp = jnp.dot(v_ref[0], wv_ref[...],
                     preferred_element_type=jnp.float32) + bv_ref[...]      # (S, E) f32
        k_scr[...] = kp.astype(jnp.bfloat16)
        v_scr[...] = vp.astype(jnp.bfloat16)

    # Q projection for this tile: single full-width matmul; 1/sqrt(Dh) pre-folded.
    qp = jnp.dot(q_ref[0], wq_ref[...],
                 preferred_element_type=jnp.float32) + bq_ref[...]          # (tq, E) f32
    qb = qp.astype(jnp.bfloat16)                                            # (tq, E)

    kb = k_scr[...]                                                         # (S, E) bf16
    vb = v_scr[...]                                                         # (S, E) bf16

    # Per-head attention (inherent to MHA); static unrolled loop, no activation
    # replication and no (H,S,E) intermediates.
    ctx_parts = []
    for h in range(H):
        sl = slice(h * Dh, (h + 1) * Dh)
        qh = qb[:, sl]                                                      # (tq, Dh)
        kh = kb[:, sl]                                                      # (S, Dh)
        # scores = qh @ kh.T (contract the Dh dims, no explicit transpose)
        s = lax.dot_general(qh, kh, (((1,), (1,)), ((), ())),
                            preferred_element_type=jnp.float32)             # (tq, S)
        # numerically-stable softmax; reciprocal goes to the EUP slot
        s = s - jnp.max(s, axis=-1, keepdims=True)
        ex = jnp.exp(s)
        p = ex * pl.reciprocal(jnp.sum(ex, axis=-1, keepdims=True), approx=True)
        if emit_attn:
            attn_ref[0, h] = p                                              # (tq, S) f32
        # dropout(attention) is identity in eval mode.
        vh = vb[:, sl]                                                      # (S, Dh)
        ctx_parts.append(jnp.dot(p.astype(jnp.bfloat16), vh,
                                 preferred_element_type=jnp.float32))       # (tq, Dh)

    # Re-pack context to (tq, H*Dh) and run ONE full-width output projection.
    ctx = jnp.concatenate(ctx_parts, axis=-1).astype(jnp.bfloat16)          # (tq, E)
    out = jnp.dot(ctx, wo_ref[...],
                  preferred_element_type=jnp.float32) + bo_ref[...]         # (tq, E)
    out_ref[0] = out


def _choose_q_tile(S):
    if S <= 512:
        return S
    for cand in (512, 256, 128):
        if S % cand == 0:
            return cand
    return S


def _vmem_limit_bytes():
    cap = 64 * 1024 * 1024
    try:
        cap = int(pltpu.get_tpu_info().vmem_capacity_bytes)
    except Exception:
        pass
    # Leave headroom for double-buffered I/O blocks; <= 48 MiB on v7x, <= 100 MiB elsewhere.
    return int(min(cap * 3 // 4, 100 * 1024 * 1024))


@functools.partial(jax.jit, static_argnames=("n_heads", "return_attention"))
def multi_headed_attention(query, key, value, params, *, n_heads, return_attention=True):
    """Pallas wrapper. Returns (x, attention) like the PyTorch module (mask=None, eval),
    or just x when return_attention=False (skips the quadratic HBM writeback)."""
    B, S, E = query.shape
    H = n_heads
    assert E % H == 0
    Dh = E // H
    wq, bq, wk, bk, wv, bv, wo, bo = params

    inv_scale = jnp.float32(1.0 / math.sqrt(Dh))
    cdt = jnp.bfloat16

    # PyTorch (out,in) -> x@W layout (in,out); fold 1/sqrt(Dh) into the Q projection.
    wq_x = (wq.T * inv_scale).astype(cdt)
    wk_x = wk.T.astype(cdt)
    wv_x = wv.T.astype(cdt)
    wo_x = wo.T.astype(cdt)
    bq_x = (bq * inv_scale).reshape(1, E).astype(jnp.float32)
    bk_x = bk.reshape(1, E).astype(jnp.float32)
    bv_x = bv.reshape(1, E).astype(jnp.float32)
    bo_x = bo.reshape(1, E).astype(jnp.float32)

    # bf16 activations: halves input DMA, MXU-native operand width.
    q_in = query.astype(cdt)
    k_in = key.astype(cdt)
    v_in = value.astype(cdt)

    tq = _choose_q_tile(S)
    nq = S // tq

    q_spec = pl.BlockSpec((1, tq, E), lambda b, qi: (b, qi, 0))
    kv_spec = pl.BlockSpec((1, S, E), lambda b, qi: (b, 0, 0))   # constant over qi -> fetched once
    w_spec = pl.BlockSpec((E, E), lambda b, qi: (0, 0))
    b_spec = pl.BlockSpec((1, E), lambda b, qi: (0, 0))
    x_spec = pl.BlockSpec((1, tq, E), lambda b, qi: (b, qi, 0))
    attn_spec = pl.BlockSpec((1, H, tq, S), lambda b, qi: (b, 0, qi, 0))

    if return_attention:
        out_shape = (jax.ShapeDtypeStruct((B, S, E), jnp.float32),
                     jax.ShapeDtypeStruct((B, H, S, S), jnp.float32))
        out_specs = (x_spec, attn_spec)
    else:
        out_shape = jax.ShapeDtypeStruct((B, S, E), jnp.float32)
        out_specs = x_spec

    kernel = functools.partial(_mha_kernel, n_heads=H, emit_attn=return_attention)

    result = pl.pallas_call(
        kernel,
        out_shape=out_shape,
        grid=(B, nq),
        in_specs=[q_spec, kv_spec, kv_spec,
                  w_spec, b_spec, w_spec, b_spec, w_spec, b_spec,
                  w_spec, b_spec],
        out_specs=out_specs,
        scratch_shapes=[pltpu.VMEM((S, E), jnp.bfloat16),   # projected K (per batch element)
                        pltpu.VMEM((S, E), jnp.bfloat16)],  # projected V
        compiler_params=pltpu.CompilerParams(
            dimension_semantics=("parallel", "arbitrary"),
            vmem_limit_bytes=_vmem_limit_bytes(),
        ),
    )(q_in, k_in, v_in, wq_x, bq_x, wk_x, bk_x, wv_x, bv_x, wo_x, bo_x)

    return result


def mha_reference(query, key, value, params, n_heads):
    """Pure-JAX f32 reference mirroring the PyTorch forward (mask=None, eval mode)."""
    wq, bq, wk, bk, wv, bv, wo, bo = params
    B, S, E = query.shape
    Dh = E // n_heads
    Q = query @ wq.T + bq
    K = key @ wk.T + bk
    V = value @ wv.T + bv
    Q = Q.reshape(B, S, n_heads, Dh).transpose(0, 2, 1, 3)
    K = K.reshape(B, S, n_heads, Dh).transpose(0, 2, 1, 3)
    V = V.reshape(B, S, n_heads, Dh).transpose(0, 2, 1, 3)
    score = jnp.einsum('bhqd,bhkd->bhqk', Q, K) / jnp.sqrt(jnp.float32(Dh))
    attn = jax.nn.softmax(score, axis=-1)
    x = jnp.einsum('bhqk,bhkd->bhqd', attn, V)
    x = x.transpose(0, 2, 1, 3).reshape(B, S, E)
    x = x @ wo.T + bo
    return x, attn


def init_params(key, embedding_dim):
    """Deterministic init mimicking nn.Linear defaults: U(-1/sqrt(in), 1/sqrt(in))."""
    E = embedding_dim
    bound = 1.0 / math.sqrt(E)
    keys = jax.random.split(key, 8)
    wq = jax.random.uniform(keys[0], (E, E), jnp.float32, -bound, bound)
    bq = jax.random.uniform(keys[1], (E,), jnp.float32, -bound, bound)
    wk = jax.random.uniform(keys[2], (E, E), jnp.float32, -bound, bound)
    bk = jax.random.uniform(keys[3], (E,), jnp.float32, -bound, bound)
    wv = jax.random.uniform(keys[4], (E, E), jnp.float32, -bound, bound)
    bv = jax.random.uniform(keys[5], (E,), jnp.float32, -bound, bound)
    wo = jax.random.uniform(keys[6], (E, E), jnp.float32, -bound, bound)
    bo = jax.random.uniform(keys[7], (E,), jnp.float32, -bound, bound)
    return (wq, bq, wk, bk, wv, bv, wo, bo)


if __name__ == "__main__":
    B, S, E, H = 2, 8, 32, 4  # batch, seq, embedding_dim, n_attention_heads

    root = jax.random.PRNGKey(0)
    kp, kq, kk, kv = jax.random.split(root, 4)
    params = init_params(kp, E)

    query = jax.random.normal(kq, (B, S, E), jnp.float32)
    key_ = jax.random.normal(kk, (B, S, E), jnp.float32)
    value = jax.random.normal(kv, (B, S, E), jnp.float32)

    # Full module semantics: returns (x, attention).
    out, attn = multi_headed_attention(query, key_, value, params, n_heads=H)
    out = jax.block_until_ready(out)
    attn = jax.block_until_ready(attn)

    ref_out, ref_attn = mha_reference(query, key_, value, params, H)
    assert out.shape == (B, S, E) and attn.shape == (B, H, S, S)
    # bf16 MXU operands + approx reciprocal => relaxed tolerances vs f32 reference.
    np.testing.assert_allclose(np.asarray(out), np.asarray(ref_out), atol=2e-2, rtol=2e-2)
    np.testing.assert_allclose(np.asarray(attn), np.asarray(ref_attn), atol=2e-2, rtol=2e-2)

    # Fast path that skips the quadratic attention-map HBM writeback.
    out_only = multi_headed_attention(query, key_, value, params,
                                      n_heads=H, return_attention=False)
    out_only = jax.block_until_ready(out_only)
    np.testing.assert_allclose(np.asarray(out_only), np.asarray(ref_out),
                               atol=2e-2, rtol=2e-2)

    print("KERNEL_OK")
</pallas_src>

<mosaic_0001>
module attributes {stable_mosaic.version = 11 : i64} {
  func.func @_mha_kernel(%arg0: i32, %arg1: i32, %arg2: memref<1x8x32xbf16, #tpu.memory_space<vmem>>, %arg3: memref<1x8x32xbf16, #tpu.memory_space<vmem>>, %arg4: memref<1x8x32xbf16, #tpu.memory_space<vmem>>, %arg5: memref<32x32xbf16, #tpu.memory_space<vmem>>, %arg6: memref<1x32xf32, #tpu.memory_space<vmem>>, %arg7: memref<32x32xbf16, #tpu.memory_space<vmem>>, %arg8: memref<1x32xf32, #tpu.memory_space<vmem>>, %arg9: memref<32x32xbf16, #tpu.memory_space<vmem>>, %arg10: memref<1x32xf32, #tpu.memory_space<vmem>>, %arg11: memref<32x32xbf16, #tpu.memory_space<vmem>>, %arg12: memref<1x32xf32, #tpu.memory_space<vmem>>, %arg13: memref<1x8x32xf32, #tpu.memory_space<vmem>>, %arg14: memref<1x4x8x8xf32, #tpu.memory_space<vmem>>, %arg15: memref<8x32xbf16, #tpu.memory_space<vmem>>, %arg16: memref<8x32xbf16, #tpu.memory_space<vmem>>) attributes {dimension_semantics = [#tpu.dimension_semantics<parallel>, #tpu.dimension_semantics<arbitrary>], iteration_bounds = array<i64: 2, 1>, scalar_prefetch = 0 : i64, scratch_operands = 2 : i64, tpu.core_type = #tpu.core_type<tc>, window_params = [{transform_indices = @transform_0, window_bounds = array<i64: 1, 8, 32>}, {transform_indices = @transform_1, window_bounds = array<i64: 1, 8, 32>}, {transform_indices = @transform_2, window_bounds = array<i64: 1, 8, 32>}, {pipeline_mode = #tpu.pipeline_mode<synchronous>, transform_indices = @transform_3, window_bounds = array<i64: 32, 32>}, {pipeline_mode = #tpu.pipeline_mode<synchronous>, transform_indices = @transform_4, window_bounds = array<i64: 1, 32>}, {pipeline_mode = #tpu.pipeline_mode<synchronous>, transform_indices = @transform_5, window_bounds = array<i64: 32, 32>}, {pipeline_mode = #tpu.pipeline_mode<synchronous>, transform_indices = @transform_6, window_bounds = array<i64: 1, 32>}, {pipeline_mode = #tpu.pipeline_mode<synchronous>, transform_indices = @transform_7, window_bounds = array<i64: 32, 32>}, {pipeline_mode = #tpu.pipeline_mode<synchronous>, transform_indices = @transform_8, window_bounds = array<i64: 1, 32>}, {pipeline_mode = #tpu.pipeline_mode<synchronous>, transform_indices = @transform_9, window_bounds = array<i64: 32, 32>}, {pipeline_mode = #tpu.pipeline_mode<synchronous>, transform_indices = @transform_10, window_bounds = array<i64: 1, 32>}, {transform_indices = @transform_11, window_bounds = array<i64: 1, 8, 32>}, {transform_indices = @transform_12, window_bounds = array<i64: 1, 4, 8, 8>}]} {
    %c0_i32 = arith.constant 0 : i32
    %0 = arith.cmpi eq, %arg1, %c0_i32 : i32
    %1 = arith.extui %0 : i1 to i32
    %c0_i32_0 = arith.constant 0 : i32
    %2 = arith.cmpi ne, %1, %c0_i32_0 : i32
    scf.if %2 {
      %c0_48 = arith.constant 0 : index
      %c0_49 = arith.constant 0 : index
      %c0_50 = arith.constant 0 : index
      %99 = vector.load %arg3[%c0_48, %c0_49, %c0_50] : memref<1x8x32xbf16, #tpu.memory_space<vmem>>, vector<1x8x32xbf16>
      %100 = vector.shape_cast %99 : vector<1x8x32xbf16> to vector<8x32xbf16>
      %c0_51 = arith.constant 0 : index
      %c0_52 = arith.constant 0 : index
      %101 = vector.load %arg7[%c0_51, %c0_52] : memref<32x32xbf16, #tpu.memory_space<vmem>>, vector<32x32xbf16>
      %cst_53 = arith.constant dense<0.000000e+00> : vector<8x32xf32>
      %102 = tpu.matmul %100, %101, %cst_53 {dimension_numbers = #tpu.dot_dimension_numbers<[1], [0], [0], [1], [0, 0, 1, 1], [], []>} : vector<8x32xbf16>, vector<32x32xbf16>, vector<8x32xf32> -> vector<8x32xf32>
      %c0_54 = arith.constant 0 : index
      %c0_55 = arith.constant 0 : index
      %103 = vector.load %arg8[%c0_54, %c0_55] : memref<1x32xf32, #tpu.memory_space<vmem>>, vector<1x32xf32>
      %104 = vector.broadcast %103 : vector<1x32xf32> to vector<8x32xf32>
      %105 = arith.addf %102, %104 : vector<8x32xf32>
      %c0_56 = arith.constant 0 : index
      %c0_57 = arith.constant 0 : index
      %c0_58 = arith.constant 0 : index
      %106 = vector.load %arg4[%c0_56, %c0_57, %c0_58] : memref<1x8x32xbf16, #tpu.memory_space<vmem>>, vector<1x8x32xbf16>
      %107 = vector.shape_cast %106 : vector<1x8x32xbf16> to vector<8x32xbf16>
      %c0_59 = arith.constant 0 : index
      %c0_60 = arith.constant 0 : index
      %108 = vector.load %arg9[%c0_59, %c0_60] : memref<32x32xbf16, #tpu.memory_space<vmem>>, vector<32x32xbf16>
      %cst_61 = arith.constant dense<0.000000e+00> : vector<8x32xf32>
      %109 = tpu.matmul %107, %108, %cst_61 {dimension_numbers = #tpu.dot_dimension_numbers<[1], [0], [0], [1], [0, 0, 1, 1], [], []>} : vector<8x32xbf16>, vector<32x32xbf16>, vector<8x32xf32> -> vector<8x32xf32>
      %c0_62 = arith.constant 0 : index
      %c0_63 = arith.constant 0 : index
      %110 = vector.load %arg10[%c0_62, %c0_63] : memref<1x32xf32, #tpu.memory_space<vmem>>, vector<1x32xf32>
      %111 = vector.broadcast %110 : vector<1x32xf32> to vector<8x32xf32>
      %112 = arith.addf %109, %111 : vector<8x32xf32>
      %113 = arith.truncf %105 : vector<8x32xf32> to vector<8x32xbf16>
      %c0_64 = arith.constant 0 : index
      %c0_65 = arith.constant 0 : index
      %114 = vector.load %arg15[%c0_64, %c0_65] : memref<8x32xbf16, #tpu.memory_space<vmem>>, vector<8x32xbf16>
      tpu.vector_store %arg15[%c0_64, %c0_65], %113 {strides = array<i32>} : memref<8x32xbf16, #tpu.memory_space<vmem>>, vector<8x32xbf16>,
      %115 = arith.truncf %112 : vector<8x32xf32> to vector<8x32xbf16>
      %c0_66 = arith.constant 0 : index
      %c0_67 = arith.constant 0 : index
      %116 = vector.load %arg16[%c0_66, %c0_67] : memref<8x32xbf16, #tpu.memory_space<vmem>>, vector<8x32xbf16>
      tpu.vector_store %arg16[%c0_66, %c0_67], %115 {strides = array<i32>} : memref<8x32xbf16, #tpu.memory_space<vmem>>, vector<8x32xbf16>,
    } else {
    }
    %c0 = arith.constant 0 : index
    %c0_1 = arith.constant 0 : index
    %c0_2 = arith.constant 0 : index
    %3 = vector.load %arg2[%c0, %c0_1, %c0_2] : memref<1x8x32xbf16, #tpu.memory_space<vmem>>, vector<1x8x32xbf16>
    %4 = vector.shape_cast %3 : vector<1x8x32xbf16> to vector<8x32xbf16>
    %c0_3 = arith.constant 0 : index
    %c0_4 = arith.constant 0 : index
    %5 = vector.load %arg5[%c0_3, %c0_4] : memref<32x32xbf16, #tpu.memory_space<vmem>>, vector<32x32xbf16>
    %cst = arith.constant dense<0.000000e+00> : vector<8x32xf32>
    %6 = tpu.matmul %4, %5, %cst {dimension_numbers = #tpu.dot_dimension_numbers<[1], [0], [0], [1], [0, 0, 1, 1], [], []>} : vector<8x32xbf16>, vector<32x32xbf16>, vector<8x32xf32> -> vector<8x32xf32>
    %c0_5 = arith.constant 0 : index
    %c0_6 = arith.constant 0 : index
    %7 = vector.load %arg6[%c0_5, %c0_6] : memref<1x32xf32, #tpu.memory_space<vmem>>, vector<1x32xf32>
    %8 = vector.broadcast %7 : vector<1x32xf32> to vector<8x32xf32>
    %9 = arith.addf %6, %8 : vector<8x32xf32>
    %10 = arith.truncf %9 : vector<8x32xf32> to vector<8x32xbf16>
    %c0_7 = arith.constant 0 : index
    %c0_8 = arith.constant 0 : index
    %11 = vector.load %arg15[%c0_7, %c0_8] : memref<8x32xbf16, #tpu.memory_space<vmem>>, vector<8x32xbf16>
    %c0_9 = arith.constant 0 : index
    %c0_10 = arith.constant 0 : index
    %12 = vector.load %arg16[%c0_9, %c0_10] : memref<8x32xbf16, #tpu.memory_space<vmem>>, vector<8x32xbf16>
    %13 = vector.extract_strided_slice %10 {offsets = [0, 0], sizes = [8, 8], strides = [1, 1]} : vector<8x32xbf16> to vector<8x8xbf16>
    %14 = vector.extract_strided_slice %11 {offsets = [0, 0], sizes = [8, 8], strides = [1, 1]} : vector<8x32xbf16> to vector<8x8xbf16>
    %cst_11 = arith.constant dense<0.000000e+00> : vector<8x8xf32>
    %15 = tpu.matmul %13, %14, %cst_11 {dimension_numbers = #tpu.dot_dimension_numbers<[1], [1], [0], [0], [0, 0, 1, 0], [], []>} : vector<8x8xbf16>, vector<8x8xbf16>, vector<8x8xf32> -> vector<8x8xf32>
    %cst_12 = arith.constant dense<0xFF800000> : vector<8xf32>
    %16 = vector.multi_reduction <maximumf>, %15, %cst_12 [1] : vector<8x8xf32> to vector<8xf32>
    %17 = vector.shape_cast %16 : vector<8xf32> to vector<8x1xf32>
    %18 = vector.broadcast %17 : vector<8x1xf32> to vector<8x8xf32>
    %19 = arith.subf %15, %18 : vector<8x8xf32>
    %20 = math.exp %19 : vector<8x8xf32>
    %cst_13 = arith.constant dense<0.000000e+00> : vector<8xf32>
    %21 = vector.multi_reduction <add>, %20, %cst_13 [1] : vector<8x8xf32> to vector<8xf32>
    %22 = vector.shape_cast %21 : vector<8xf32> to vector<8x1xf32>
    %23 = tpu.reciprocal %22 {approx = true} : vector<8x1xf32> -> vector<8x1xf32>
    %24 = vector.broadcast %23 : vector<8x1xf32> to vector<8x8xf32>
    %25 = arith.mulf %20, %24 : vector<8x8xf32>
    %c0_14 = arith.constant 0 : index
    %c0_15 = arith.constant 0 : index
    %c0_16 = arith.constant 0 : index
    %c0_17 = arith.constant 0 : index
    %26 = vector.load %arg14[%c0_14, %c0_15, %c0_16, %c0_17] : memref<1x4x8x8xf32, #tpu.memory_space<vmem>>, vector<1x1x8x8xf32>
    %27 = vector.shape_cast %26 : vector<1x1x8x8xf32> to vector<8x8xf32>
    %28 = vector.shape_cast %25 : vector<8x8xf32> to vector<1x1x8x8xf32>
    tpu.vector_store %arg14[%c0_14, %c0_15, %c0_16, %c0_17], %28 {strides = array<i32>} : memref<1x4x8x8xf32, #tpu.memory_space<vmem>>, vector<1x1x8x8xf32>,
    %29 = vector.extract_strided_slice %12 {offsets = [0, 0], sizes = [8, 8], strides = [1, 1]} : vector<8x32xbf16> to vector<8x8xbf16>
    %30 = arith.truncf %25 : vector<8x8xf32> to vector<8x8xbf16>
    %cst_18 = arith.constant dense<0.000000e+00> : vector<8x8xf32>
    %31 = tpu.matmul %30, %29, %cst_18 {dimension_numbers = #tpu.dot_dimension_numbers<[1], [0], [0], [1], [0, 0, 1, 1], [], []>} : vector<8x8xbf16>, vector<8x8xbf16>, vector<8x8xf32> -> vector<8x8xf32>
    %32 = vector.extract_strided_slice %10 {offsets = [0, 8], sizes = [8, 8], strides = [1, 1]} : vector<8x32xbf16> to vector<8x8xbf16>
    %33 = vector.extract_strided_slice %11 {offsets = [0, 8], sizes = [8, 8], strides = [1, 1]} : vector<8x32xbf16> to vector<8x8xbf16>
    %cst_19 = arith.constant dense<0.000000e+00> : vector<8x8xf32>
    %34 = tpu.matmul %32, %33, %cst_19 {dimension_numbers = #tpu.dot_dimension_numbers<[1], [1], [0], [0], [0, 0, 1, 0], [], []>} : vector<8x8xbf16>, vector<8x8xbf16>, vector<8x8xf32> -> vector<8x8xf32>
    %cst_20 = arith.constant dense<0xFF800000> : vector<8xf32>
    %35 = vector.multi_reduction <maximumf>, %34, %cst_20 [1] : vector<8x8xf32> to vector<8xf32>
    %36 = vector.shape_cast %35 : vector<8xf32> to vector<8x1xf32>
    %37 = vector.broadcast %36 : vector<8x1xf32> to vector<8x8xf32>
    %38 = arith.subf %34, %37 : vector<8x8xf32>
    %39 = math.exp %38 : vector<8x8xf32>
    %cst_21 = arith.constant dense<0.000000e+00> : vector<8xf32>
    %40 = vector.multi_reduction <add>, %39, %cst_21 [1] : vector<8x8xf32> to vector<8xf32>
    %41 = vector.shape_cast %40 : vector<8xf32> to vector<8x1xf32>
    %42 = tpu.reciprocal %41 {approx = true} : vector<8x1xf32> -> vector<8x1xf32>
    %43 = vector.broadcast %42 : vector<8x1xf32> to vector<8x8xf32>
    %44 = arith.mulf %39, %43 : vector<8x8xf32>
    %c0_22 = arith.constant 0 : index
    %c1 = arith.constant 1 : index
    %c0_23 = arith.constant 0 : index
    %c0_24 = arith.constant 0 : index
    %45 = vector.load %arg14[%c0_22, %c1, %c0_23, %c0_24] : memref<1x4x8x8xf32, #tpu.memory_space<vmem>>, vector<1x1x8x8xf32>
    %46 = vector.shape_cast %45 : vector<1x1x8x8xf32> to vector<8x8xf32>
    %47 = vector.shape_cast %44 : vector<8x8xf32> to vector<1x1x8x8xf32>
    tpu.vector_store %arg14[%c0_22, %c1, %c0_23, %c0_24], %47 {strides = array<i32>} : memref<1x4x8x8xf32, #tpu.memory_space<vmem>>, vector<1x1x8x8xf32>,
    %48 = vector.extract_strided_slice %12 {offsets = [0, 8], sizes = [8, 8], strides = [1, 1]} : vector<8x32xbf16> to vector<8x8xbf16>
    %49 = arith.truncf %44 : vector<8x8xf32> to vector<8x8xbf16>
    %cst_25 = arith.constant dense<0.000000e+00> : vector<8x8xf32>
    %50 = tpu.matmul %49, %48, %cst_25 {dimension_numbers = #tpu.dot_dimension_numbers<[1], [0], [0], [1], [0, 0, 1, 1], [], []>} : vector<8x8xbf16>, vector<8x8xbf16>, vector<8x8xf32> -> vector<8x8xf32>
    %51 = vector.extract_strided_slice %10 {offsets = [0, 16], sizes = [8, 8], strides = [1, 1]} : vector<8x32xbf16> to vector<8x8xbf16>
    %52 = vector.extract_strided_slice %11 {offsets = [0, 16], sizes = [8, 8], strides = [1, 1]} : vector<8x32xbf16> to vector<8x8xbf16>
    %cst_26 = arith.constant dense<0.000000e+00> : vector<8x8xf32>
    %53 = tpu.matmul %51, %52, %cst_26 {dimension_numbers = #tpu.dot_dimension_numbers<[1], [1], [0], [0], [0, 0, 1, 0], [], []>} : vector<8x8xbf16>, vector<8x8xbf16>, vector<8x8xf32> -> vector<8x8xf32>
    %cst_27 = arith.constant dense<0xFF800000> : vector<8xf32>
    %54 = vector.multi_reduction <maximumf>, %53, %cst_27 [1] : vector<8x8xf32> to vector<8xf32>
    %55 = vector.shape_cast %54 : vector<8xf32> to vector<8x1xf32>
    %56 = vector.broadcast %55 : vector<8x1xf32> to vector<8x8xf32>
    %57 = arith.subf %53, %56 : vector<8x8xf32>
    %58 = math.exp %57 : vector<8x8xf32>
    %cst_28 = arith.constant dense<0.000000e+00> : vector<8xf32>
    %59 = vector.multi_reduction <add>, %58, %cst_28 [1] : vector<8x8xf32> to vector<8xf32>
    %60 = vector.shape_cast %59 : vector<8xf32> to vector<8x1xf32>
    %61 = tpu.reciprocal %60 {approx = true} : vector<8x1xf32> -> vector<8x1xf32>
    %62 = vector.broadcast %61 : vector<8x1xf32> to vector<8x8xf32>
    %63 = arith.mulf %58, %62 : vector<8x8xf32>
    %c0_29 = arith.constant 0 : index
    %c2 = arith.constant 2 : index
    %c0_30 = arith.constant 0 : index
    %c0_31 = arith.constant 0 : index
    %64 = vector.load %arg14[%c0_29, %c2, %c0_30, %c0_31] : memref<1x4x8x8xf32, #tpu.memory_space<vmem>>, vector<1x1x8x8xf32>
    %65 = vector.shape_cast %64 : vector<1x1x8x8xf32> to vector<8x8xf32>
    %66 = vector.shape_cast %63 : vector<8x8xf32> to vector<1x1x8x8xf32>
    tpu.vector_store %arg14[%c0_29, %c2, %c0_30, %c0_31], %66 {strides = array<i32>} : memref<1x4x8x8xf32, #tpu.memory_space<vmem>>, vector<1x1x8x8xf32>,
    %67 = vector.extract_strided_slice %12 {offsets = [0, 16], sizes = [8, 8], strides = [1, 1]} : vector<8x32xbf16> to vector<8x8xbf16>
    %68 = arith.truncf %63 : vector<8x8xf32> to vector<8x8xbf16>
    %cst_32 = arith.constant dense<0.000000e+00> : vector<8x8xf32>
    %69 = tpu.matmul %68, %67, %cst_32 {dimension_numbers = #tpu.dot_dimension_numbers<[1], [0], [0], [1], [0, 0, 1, 1], [], []>} : vector<8x8xbf16>, vector<8x8xbf16>, vector<8x8xf32> -> vector<8x8xf32>
    %70 = vector.extract_strided_slice %10 {offsets = [0, 24], sizes = [8, 8], strides = [1, 1]} : vector<8x32xbf16> to vector<8x8xbf16>
    %71 = vector.extract_strided_slice %11 {offsets = [0, 24], sizes = [8, 8], strides = [1, 1]} : vector<8x32xbf16> to vector<8x8xbf16>
    %cst_33 = arith.constant dense<0.000000e+00> : vector<8x8xf32>
    %72 = tpu.matmul %70, %71, %cst_33 {dimension_numbers = #tpu.dot_dimension_numbers<[1], [1], [0], [0], [0, 0, 1, 0], [], []>} : vector<8x8xbf16>, vector<8x8xbf16>, vector<8x8xf32> -> vector<8x8xf32>
    %cst_34 = arith.constant dense<0xFF800000> : vector<8xf32>
    %73 = vector.multi_reduction <maximumf>, %72, %cst_34 [1] : vector<8x8xf32> to vector<8xf32>
    %74 = vector.shape_cast %73 : vector<8xf32> to vector<8x1xf32>
    %75 = vector.broadcast %74 : vector<8x1xf32> to vector<8x8xf32>
    %76 = arith.subf %72, %75 : vector<8x8xf32>
    %77 = math.exp %76 : vector<8x8xf32>
    %cst_35 = arith.constant dense<0.000000e+00> : vector<8xf32>
    %78 = vector.multi_reduction <add>, %77, %cst_35 [1] : vector<8x8xf32> to vector<8xf32>
    %79 = vector.shape_cast %78 : vector<8xf32> to vector<8x1xf32>
    %80 = tpu.reciprocal %79 {approx = true} : vector<8x1xf32> -> vector<8x1xf32>
    %81 = vector.broadcast %80 : vector<8x1xf32> to vector<8x8xf32>
    %82 = arith.mulf %77, %81 : vector<8x8xf32>
    %c0_36 = arith.constant 0 : index
    %c3 = arith.constant 3 : index
    %c0_37 = arith.constant 0 : index
    %c0_38 = arith.constant 0 : index
    %83 = vector.load %arg14[%c0_36, %c3, %c0_37, %c0_38] : memref<1x4x8x8xf32, #tpu.memory_space<vmem>>, vector<1x1x8x8xf32>
    %84 = vector.shape_cast %83 : vector<1x1x8x8xf32> to vector<8x8xf32>
    %85 = vector.shape_cast %82 : vector<8x8xf32> to vector<1x1x8x8xf32>
    tpu.vector_store %arg14[%c0_36, %c3, %c0_37, %c0_38], %85 {strides = array<i32>} : memref<1x4x8x8xf32, #tpu.memory_space<vmem>>, vector<1x1x8x8xf32>,
    %86 = vector.extract_strided_slice %12 {offsets = [0, 24], sizes = [8, 8], strides = [1, 1]} : vector<8x32xbf16> to vector<8x8xbf16>
    %87 = arith.truncf %82 : vector<8x8xf32> to vector<8x8xbf16>
    %cst_39 = arith.constant dense<0.000000e+00> : vector<8x8xf32>
    %88 = tpu.matmul %87, %86, %cst_39 {dimension_numbers = #tpu.dot_dimension_numbers<[1], [0], [0], [1], [0, 0, 1, 1], [], []>} : vector<8x8xbf16>, vector<8x8xbf16>, vector<8x8xf32> -> vector<8x8xf32>
    %89 = tpu.concatenate %31, %50, %69, %88 in 1 : vector<8x8xf32>, vector<8x8xf32>, vector<8x8xf32>, vector<8x8xf32> -> vector<8x32xf32>
    %90 = arith.truncf %89 : vector<8x32xf32> to vector<8x32xbf16>
    %c0_40 = arith.constant 0 : index
    %c0_41 = arith.constant 0 : index
    %91 = vector.load %arg11[%c0_40, %c0_41] : memref<32x32xbf16, #tpu.memory_space<vmem>>, vector<32x32xbf16>
    %cst_42 = arith.constant dense<0.000000e+00> : vector<8x32xf32>
    %92 = tpu.matmul %90, %91, %cst_42 {dimension_numbers = #tpu.dot_dimension_numbers<[1], [0], [0], [1], [0, 0, 1, 1], [], []>} : vector<8x32xbf16>, vector<32x32xbf16>, vector<8x32xf32> -> vector<8x32xf32>
    %c0_43 = arith.constant 0 : index
    %c0_44 = arith.constant 0 : index
    %93 = vector.load %arg12[%c0_43, %c0_44] : memref<1x32xf32, #tpu.memory_space<vmem>>, vector<1x32xf32>
    %94 = vector.broadcast %93 : vector<1x32xf32> to vector<8x32xf32>
    %95 = arith.addf %92, %94 : vector<8x32xf32>
    %c0_45 = arith.constant 0 : index
    %c0_46 = arith.constant 0 : index
    %c0_47 = arith.constant 0 : index
    %96 = vector.load %arg13[%c0_45, %c0_46, %c0_47] : memref<1x8x32xf32, #tpu.memory_space<vmem>>, vector<1x8x32xf32>
    %97 = vector.shape_cast %96 : vector<1x8x32xf32> to vector<8x32xf32>
    %98 = vector.shape_cast %95 : vector<8x32xf32> to vector<1x8x32xf32>
    tpu.vector_store %arg13[%c0_45, %c0_46, %c0_47], %98 {strides = array<i32>} : memref<1x8x32xf32, #tpu.memory_space<vmem>>, vector<1x8x32xf32>,
    return
  }
  func.func @transform_0(%arg0: i32, %arg1: i32) -> (i32, i32, i32) {
    %c0_i32 = arith.constant 0 : i32
    %c0_i32_0 = arith.constant 0 : i32
    return %arg0, %arg1, %c0_i32 : i32, i32, i32
  }
  func.func @transform_1(%arg0: i32, %arg1: i32) -> (i32, i32, i32) {
    %c0_i32 = arith.constant 0 : i32
    %c0_i32_0 = arith.constant 0 : i32
    %c0_i32_1 = arith.constant 0 : i32
    return %arg0, %c0_i32, %c0_i32_0 : i32, i32, i32
  }
  func.func @transform_2(%arg0: i32, %arg1: i32) -> (i32, i32, i32) {
    %c0_i32 = arith.constant 0 : i32
    %c0_i32_0 = arith.constant 0 : i32
    %c0_i32_1 = arith.constant 0 : i32
    return %arg0, %c0_i32, %c0_i32_0 : i32, i32, i32
  }
  func.func @transform_3(%arg0: i32, %arg1: i32) -> (i32, i32) {
    %c0_i32 = arith.constant 0 : i32
    %c0_i32_0 = arith.constant 0 : i32
    %c0_i32_1 = arith.constant 0 : i32
    return %c0_i32, %c0_i32_0 : i32, i32
  }
  func.func @transform_4(%arg0: i32, %arg1: i32) -> (i32, i32) {
    %c0_i32 = arith.constant 0 : i32
    %c0_i32_0 = arith.constant 0 : i32
    %c0_i32_1 = arith.constant 0 : i32
    return %c0_i32, %c0_i32_0 : i32, i32
  }
  func.func @transform_5(%arg0: i32, %arg1: i32) -> (i32, i32) {
    %c0_i32 = arith.constant 0 : i32
    %c0_i32_0 = arith.constant 0 : i32
    %c0_i32_1 = arith.constant 0 : i32
    return %c0_i32, %c0_i32_0 : i32, i32
  }
  func.func @transform_6(%arg0: i32, %arg1: i32) -> (i32, i32) {
    %c0_i32 = arith.constant 0 : i32
    %c0_i32_0 = arith.constant 0 : i32
    %c0_i32_1 = arith.constant 0 : i32
    return %c0_i32, %c0_i32_0 : i32, i32
  }
  func.func @transform_7(%arg0: i32, %arg1: i32) -> (i32, i32) {
    %c0_i32 = arith.constant 0 : i32
    %c0_i32_0 = arith.constant 0 : i32
    %c0_i32_1 = arith.constant 0 : i32
    return %c0_i32, %c0_i32_0 : i32, i32
  }
  func.func @transform_8(%arg0: i32, %arg1: i32) -> (i32, i32) {
    %c0_i32 = arith.constant 0 : i32
    %c0_i32_0 = arith.constant 0 : i32
    %c0_i32_1 = arith.constant 0 : i32
    return %c0_i32, %c0_i32_0 : i32, i32
  }
  func.func @transform_9(%arg0: i32, %arg1: i32) -> (i32, i32) {
    %c0_i32 = arith.constant 0 : i32
    %c0_i32_0 = arith.constant 0 : i32
    %c0_i32_1 = arith.constant 0 : i32
    return %c0_i32, %c0_i32_0 : i32, i32
  }
  func.func @transform_10(%arg0: i32, %arg1: i32) -> (i32, i32) {
    %c0_i32 = arith.constant 0 : i32
    %c0_i32_0 = arith.constant 0 : i32
    %c0_i32_1 = arith.constant 0 : i32
    return %c0_i32, %c0_i32_0 : i32, i32
  }
  func.func @transform_11(%arg0: i32, %arg1: i32) -> (i32, i32, i32) {
    %c0_i32 = arith.constant 0 : i32
    %c0_i32_0 = arith.constant 0 : i32
    return %arg0, %arg1, %c0_i32 : i32, i32, i32
  }
  func.func @transform_12(%arg0: i32, %arg1: i32) -> (i32, i32, i32, i32) {
    %c0_i32 = arith.constant 0 : i32
    %c0_i32_0 = arith.constant 0 : i32
    %c0_i32_1 = arith.constant 0 : i32
    return %arg0, %c0_i32, %arg1, %c0_i32_0 : i32, i32, i32, i32
  }
}

</mosaic_0001>

<bundles_post_ra>
// kernel: multi_headed_attention.1
= control target key start
LH: loop header
LB: loop body
LE: loop exit
PB: predicated region body
PF: predicated region fallthrough
CT: control target
= control target key end

     0   :  { %s1630_s0 = inlined_call_operand.vmem [shape: bf16[2,8,32], index: 0, kind: input, shape index: {}]   ;;  %s1631_s1 = inlined_call_operand.vmem [shape: bf16[2,8,32], index: 1, kind: input, shape index: {}]   ;;  %s1632_s2 = inlined_call_operand.vmem [shape: bf16[2,8,32], index: 2, kind: input, shape index: {}]   ;;  %s1633_s3 = inlined_call_operand.vmem [shape: bf16[32,32], index: 3, kind: input, shape index: {}]   ;;  %s1634_s4 = inlined_call_operand.vmem [shape: f32[1,32], index: 4, kind: input, shape index: {}]   ;;  %s1635_s5 = inlined_call_operand.vmem [shape: bf16[32,32], index: 5, kind: input, shape index: {}]   ;;  %s1636_s6 = inlined_call_operand.vmem [shape: f32[1,32], index: 6, kind: input, shape index: {}]   ;;  %s1637_s7 = inlined_call_operand.vmem [shape: bf16[32,32], index: 7, kind: input, shape index: {}]   ;;  %s1638_s8 = inlined_call_operand.vmem [shape: f32[1,32], index: 8, kind: input, shape index: {}]   ;;  %s1639_s9 = inlined_call_operand.vmem [shape: bf16[32,32], index: 9, kind: input, shape index: {}]   ;;  %s1640_s10 = inlined_call_operand.vmem [shape: f32[1,32], index: 10, kind: input, shape index: {}]   ;;  %s1641_s11 = inlined_call_operand.hbm [shape: f32[2,8,32], index: 11, kind: output, shape index: {0}]   ;;  %s1642_s12 = inlined_call_operand.hbm [shape: f32[2,4,8,8], index: 12, kind: output, shape index: {1}]  }
   0x1   :  { %1646 = sst [smem:[#allocation13_spill]] %s1630_s0 }
   0x2   :  { %1647 = sst [smem:[#allocation14_spill]] %s1631_s1 }
   0x3   :  { %1648 = sst [smem:[#allocation15_spill]] %s1632_s2 }
   0x4   :  { %1649 = sst [smem:[#allocation16_spill]] %s1633_s3 }
   0x5   :  { %1650 = sst [smem:[#allocation17_spill]] %s1634_s4 }
   0x6   :  { %18 = vsyncpa [#allocation5], 0 }
   0x7   :  { %20 = vsyncpa [#allocation5 + $0x1], 0 }
   0x8   :  { %21 = vsyncpa [#allocation7], 0 }
   0x9   :  { %23 = vsyncpa [#allocation7 + $0x1], 0  ;;  %s1412_s21 = smov 0   ;;  %s1414_s22 = smov 0  }
   0xa   :  { %s1416_s23 = smov 0   ;;  %s1418_s24 = smov 0  }
   0xb   :  { %s1420_s25 = smov 0   ;;  %s1422_s26 = smov 0  }
   0xc LB: > { %1651 = sst [smem:[#allocation10_spill]] %s1334_s25  ;;  %s1068_s27 = sadd.s32 4294967295, %s1338_s26   ;;  %s1338_s26 = sphi %s1422_s26, %s29_s26   ;;  %s1334_s25 = sphi %s1420_s25, %s1664_s25   ;;  %s1330_s24 = sphi %s1418_s24, %s1663_s24   ;;  %s1326_s23 = sphi %s1416_s23, %s1667_s23   ;;  %s1322_s22 = sphi %s1414_s22, %s1666_s22   ;;  %s1318_s21 = sphi %s1412_s21, %s1665_s21  }
   0xd   : > { %s1069_s28 = sadd.s32 4294967294, %s1338_s26   ;;  %s41_s29 = sadd.s32 1, %s1334_s25 }
   0xe   : > { %s298_s30 = sadd.s32 1, %s1326_s23  ;;  %p43_p0 = scmp.ge.s32.totalorder %s41_s29, 2 }
   0xf   : > { %p308_p1 = scmp.ne.s32.totalorder %s1326_s23, %s1322_s22  ;;  %p309_p2 = scmp.eq.s32.totalorder %s1068_s27, 1 }
  0x10   : > { %p314_p3 = scmp.ne.s32.totalorder %s1322_s22, %s1318_s21  ;;  %s1669_s29 = smov (%p43_p0, %s41_s29), 0 }
  0x11   : > { %1652 = sst [smem:[#allocation11_spill]] %s1669_s29  ;;  %p1452_p4 = por %p309_p2, %p308_p1 }
  0x12   : > { %p315_p5 = scmp.eq.s32.totalorder %s1069_s28, 1  ;;  %s293_s14 = ssub.s32 %s1334_s25, %s1669_s29 }
  0x13   : > { %p1072_p6 = scmp.ge.s32.totalorder %s1338_s26, 1  ;;  %p296_p7 = scmp.eq.s32.totalorder %s293_s14, 0 }
  0x14   : > { %p1459_p8 = por %p315_p5, %p314_p3  ;;  %p409_p9 = scmp.lt.s32.totalorder %s1338_s26, 3 }
  0x15   : > { %s1465_s16 = scalar_select %p296_p7, %s1326_s23, %s298_s30  }
  0x16   : > { %p410_p10 = pnand %p1072_p6, %p409_p9 }
  0x17   : > { %1655 = sst [smem:[#allocation12_spill]] %s1465_s16  ;;  %p466_p11 = scmp.lt.s32.totalorder (!%p410_p10), %s1330_s24, 1 }
  0x18   : > { %413 = sbr.rel (%p410_p10) target bundleno = 1110 (0x456), region = 64  ;;  %s1656_s3 = sld [smem:[#allocation16_spill]] (!%p410_p10) }
  0x19   : > { %s1657_s1 = sld [smem:[#allocation14_spill]] (!%p410_p10)  ;;  %s1340_s30 = smov (!%p410_p10), 112  }
  0x1a   : > { %s1658_s0 = sld [smem:[#allocation13_spill]] (!%p410_p10)  ;;  %s1341_s14 = smov (!%p410_p10), 120  }
  0x1b   : > { %s1659_s4 = sld [smem:[#allocation17_spill]] (!%p410_p10)  ;;  %s1342_s18 = smov (!%p410_p10), 104  }
  0x1c   : > { %s1660_s2 = sld [smem:[#allocation15_spill]] (!%p410_p10)  ;;  %s1538_s20 = sand.u32 (!%p410_p10), 1, %s1322_s22  }
  0x1d   : > { %v1133_v0 = vld [vmem:[%s1635_s5 + $0x8] sm:$0xff]  ;;  %v1132_v2 = vld [vmem:[%s1635_s5] sm:$0xff]  ;;  %s467_s29 = scalar_select %p466_p11, %s1330_s24, 1  ;;  %vm507_vm0 = vcmask 261120   ;;  %vm562_vm1 = vcmask 257024   ;;  %vm607_vm2 = vcmask 64512  }
  0x1e   : > { %v1137_v1 = vld [vmem:[%s1656_s3 + $0x8] sm:$0xff]  ;;  %517 = vmatpush.bf16.msra.mxu0 %v1133_v0  ;;  %v1136_v3 = vld [vmem:[%s1656_s3] sm:$0xff]  ;;  %vm643_vm3 = vcmask 1043456   ;;  %vm856_vm4 = vcmask 130048   ;;  %vm858_vm5 = vcmask 195584  }
  0x1f   : > { %597 = vmatpush.bf16.msra.mxu2 %v1137_v1  ;;  %s1481_s17 = sshll.u32 %s467_s29, 2  ;;  %v1208_v6 = vld [vmem:[%s1636_s6] ss:$0 sm:$0xff]  ;;  %v1135_v22 = vld [vmem:[%s1637_s7 + $0x8] sm:$0xff]  ;;  %s1345_s29 = smov 16  }
  0x20   : > { %s476_s19 = scalar_lea.vmem %s1657_s1, %s1481_s17  ;;  %s472_s27 = scalar_lea.vmem %s1658_s0, %s1481_s17  ;;  %554 = vmatpush.bf16.msra.mxu1 %v1135_v22  ;;  %v1134_v23 = vld [vmem:[%s1637_s7] sm:$0xff] }
  0x21   : > { %v486_v4 = vld [vmem:[%s476_s19] sm:$0xf]  ;;  %s1140_s19 = sshll.u32 %s1330_s24, 5 }
  0x22   : > { %518 = vmatpush.bf16.msra.mxu0 %v1132_v2  ;;  %v566_v5 = vld [vmem:[%s472_s27] sm:$0xf]  ;;  %s480_s16 = scalar_lea.vmem %s1660_s2, %s1481_s17  ;;  %s1074_s27 = sshll.u32 %s1538_s20, 5 }
  0x23   : > { %598 = vmatpush.bf16.msra.mxu2 %v1136_v3  ;;  %v1209_v10 = vld [vmem:[%s1659_s4] ss:$0 sm:$0xff]  ;;  %s1248_s2 = scalar_lea.hbm %s1642_s12, 64 }
  0x24   : > { %555 = vmatpush.bf16.msra.mxu1 %v1134_v23  ;;  %v524_v24 = vld [vmem:[%s480_s16] sm:$0xf]  ;;  %s904_s16 = scalar_lea.sflag [#allocation7], %s1538_s20 }
  0x25   : > { %1086 = vmatmul.msk.bf16.vlgmr.msra.gmra.mxu0 %vm507_vm0, %v486_v4  ;;  %v1210_v37 = vld [vmem:[%s1638_s8] ss:$0 sm:$0xff] }
  0x26   : > { %1104 = vmatmul.msk.bf16.vlgmr.msra.gmra.mxu2 %vm507_vm0, %v566_v5 }
  0x27   : > { %1095 = vmatmul.msk.bf16.vlgmr.msra.gmra.mxu1 %vm507_vm0, %v524_v24 }
  0xa2   : > { %v520_v7 = vpop.f32.mrf.mxu0 }
  0xa3   : > { %v521_v8 = vadd.f32 %v1208_v6, %v520_v7 }
  0xa4   : > { %v557_v38 = vpop.f32.mrf.mxu1 }
  0xa5   : > { %v561_v9 = vpack.c.bf16 %v521_v8, %v521_v8  ;;  %v558_v39 = vadd.f32 %v1210_v37, %v557_v38 }
  0xa7   : > { %563 = vst.msk [vmem:[#allocation2] sm:$0xf] %vm562_vm1, %v561_v9  ;;  %v564_v40 = vpack.c.bf16 %v558_v39, %v558_v39 }
  0xa9   : > { %v600_v11 = vpop.f32.mrf.mxu2  ;;  %565 = vst.msk [vmem:[#allocation3] sm:$0xf] %vm562_vm1, %v564_v40 }
  0xaa   : > { %v601_v12 = vadd.f32 %v1209_v10, %v600_v11  ;;  %v522_v13 = vpop.f32.mrf.mxu0 }
  0xac   : > { %v604_v14 = vpack.c.bf16 %v601_v12, %v601_v12  ;;  %v559_v41 = vpop.f32.mrf.mxu1 }
  0xad   : > { %v1139_v41 = vld [vmem:[%s1639_s9 + $0x8] sm:$0xff] }
  0xae   : > { %v661_v15 = vunpack.c.l.b16 %v604_v14  ;;  %v605_v16 = vld [vmem:[#allocation2] sm:$0xf] }
  0xaf   : > { %v612_v18 = vsel %vm607_vm2, %v605_v16, 0  ;;  %v666_v19 = vunpack.c.l.b16 %v605_v16 }
  0xb0   : > { %v662_v17 = vpack.c.b16 %v661_v15, %v661_v15  ;;  %621 = vmatpush.bf16.xpose.msra.mxu3 %v612_v18  ;;  %v606_v42 = vld [vmem:[#allocation3] sm:$0xf] }
  0xb1   : > { %v602_v20 = vpop.f32.mrf.mxu2  ;;  %v667_v21 = vpack.c.b16 %v666_v19, %v666_v19  ;;  %v645_v43 = vsel %vm643_vm3, %v606_v42, 0  ;;  %v704_v58 = vunpack.c.l.b16 %v606_v42  ;;  %v1138_v42 = vld [vmem:[%s1639_s9] sm:$0xff] }
  0xb2   : > { %727 = vrot.lane.b32.xlu2 %v662_v17, %s1340_s30  ;;  %654 = vmatpush.bf16.msrb.mxu0 %v645_v43 }
  0xb3   : > { %729 = vrot.lane.b32.xlu1 %v667_v21, %s1340_s30  ;;  %668 = vrot.lane.b32.xlu0 %v667_v21, %s1341_s14  ;;  %v705_v59 = vpack.c.b16 %v704_v58, %v704_v58 }
  0xb7   : > { %1105 = vmatmul.msk.bf16.vlgmr.msra.gmra.mxu3 %vm607_vm2, %v604_v14 }
  0xba   : > { %785 = vrot.lane.b32.xlu2 %v662_v17, %s1342_s18 }
  0xbb   : > { %787 = vrot.lane.b32.xlu1 %v667_v21, %s1342_s18  ;;  %663 = vrot.lane.b32.xlu0 %v662_v17, %s1341_s14 }
 0x10c   : > { %v728_v29 = vpop.permute.xlu2 %727 }
 0x114   : > { %v786_v35 = vpop.permute.xlu2 %785 }
 0x125   : > { %v730_v25 = vpop.permute.xlu1 %729  ;;  %v669_v26 = vpop.permute.xlu0 %668 }
 0x126   : > { %v674_v27 = vsel %vm607_vm2, %v669_v26, 0  ;;  %v735_v28 = vsel %vm607_vm2, %v730_v25, 0 }
 0x127   : > { %683 = vmatpush.bf16.xpose.msrb.mxu1 %v674_v27  ;;  %744 = vmatpush.bf16.xpose.msrb.mxu3 %v735_v28 }
 0x12d   : > { %v788_v30 = vpop.permute.xlu1 %787  ;;  %v664_v31 = vpop.permute.xlu0 %663 }
 0x12e   : > { %v793_v32 = vsel %vm607_vm2, %v788_v30, 0  ;;  %1107 = vmatmul.msk.bf16.vlgmr.msrb.gmra.mxu1 %vm607_vm2, %v664_v31  ;;  %1110 = vmatmul.msk.bf16.vlgmr.msrb.gmra.mxu3 %vm607_vm2, %v728_v29 }
 0x12f   : > { %802 = vmatpush.bf16.xpose.msra.mxu1 %v793_v32  ;;  %890 = vmatpush.bf16.msra.mxu3 %v1139_v41 }
 0x133   : > { %891 = vmatpush.bf16.msra.mxu3 %v1138_v42 }
 0x13a   : > { %v623_v33 = vpop.f32.mrf.mxu3 }
 0x13b   : > { %v627_v34 = vsel %vm607_vm2, %v623_v33, -inf }
 0x13c   : > { %628 = vmax.xlane.f32.xlu1 %v627_v34 }
 0x13e   : > { %1113 = vmatmul.msk.bf16.vlgmr.msra.gmra.mxu1 %vm607_vm2, %v786_v35 }
 0x142   : > { %v625_v36 = vpop.f32.mrf.mxu3 }
 0x1ab   : > { %v685_v44 = vpop.f32.mrf.mxu1 }
 0x1ac   : > { %v689_v45 = vsel %vm607_vm2, %v685_v44, -inf }
 0x1ad   : > { %690 = vmax.xlane.f32.xlu0 %v689_v45 }
 0x1af   : > { %v629_v46 = vpop.xlane.xlu1 %628 }
 0x1b0   : > { %v630_v47 = vsub.f32 %v623_v33, %v629_v46 }
 0x1b1   : > { %v746_v48 = vpop.f32.mrf.mxu3 }
 0x1b2   : > { %v631_v49 = vmul.f32 1.442695, %v630_v47  ;;  %v750_v57 = vsel %vm607_vm2, %v746_v48, -inf }
 0x1b3   : > { %v687_v50 = vpop.f32.mrf.mxu1 }
 0x1b4   : > { %1212 = vpow2.f32 %v631_v49 }
 0x1b9   : > { %v748_v51 = vpop.f32.mrf.mxu3 }
 0x1ba   : > { %v1213_v52 = vpop.eup %1212 }
 0x1bb   : > { %v804_v53 = vpop.f32.mrf.mxu1  ;;  %v633_v54 = vsel %vm607_vm2, %v1213_v52, 0.0 }
 0x1bc   : > { %634 = vadd.xlane.f32.xlu1 %v633_v54  ;;  %v808_v55 = vsel %vm607_vm2, %v804_v53, -inf }
 0x1bd   : > { %809 = vmax.xlane.f32.xlu2 %v808_v55 }
 0x1c3   : > { %v806_v56 = vpop.f32.mrf.mxu1 }
 0x1c5   : > { %751 = vmax.xlane.f32.xlu2 %v750_v57 }
 0x1dd   : > { %706 = vrot.lane.b32.xlu2 %v705_v59, %s1341_s14  ;;  %s1541_s14 = scalar_lea.vmem [#allocation6], %s1074_s27 }
 0x1de   : > { %s932_s28 = sshll.u32 %s1541_s14, 4  ;;  %s933_s28 = int_to_ptr.vmem [resolvable:$true] %s932_s28 }
 0x220   : > { %v691_v60 = vpop.xlane.xlu0 %690 }
 0x221   : > { %v692_v61 = vsub.f32 %v685_v44, %v691_v60 }
 0x223   : > { %v693_v62 = vmul.f32 1.442695, %v692_v61 }
 0x225   : > { %1214 = vpow2.f32 %v693_v62 }
 0x22b   : > { %v1215_v63 = vpop.eup %1214 }
 0x22c   : > { %v695_v0 = vsel %vm607_vm2, %v1215_v63, 0.0 }
 0x22d   : > { %696 = vadd.xlane.f32.xlu0 %v695_v0 }
 0x22f   : > { %v635_v1 = vpop.xlane.xlu1 %634 }
 0x230   : > { %1216 = vrcp.f32 %v635_v1  ;;  %v810_v2 = vpop.xlane.xlu2 %809 }
 0x231   : > { %v811_v3 = vsub.f32 %v804_v53, %v810_v2 }
 0x233   : > { %v812_v4 = vmul.f32 1.442695, %v811_v3 }
 0x235   : > { %1218 = vpow2.f32 %v812_v4 }
 0x236   : > { %v1217_v5 = vpop.eup %1216 }
 0x237   : > { %v637_v6 = vmul.f32 %v1217_v5, %v1213_v52 }
 0x238   : > { %v752_v7 = vpop.xlane.xlu2 %751 }
 0x239   : > { %v753_v8 = vsub.f32 %v746_v48, %v752_v7  ;;  %v639_v9 = vpack.c.bf16 %v637_v6, %v637_v6  ;;  %638 = vst.msk [vmem:[%s1541_s14] sm:$0xff] %vm607_vm2, %v637_v6 }
 0x23b   : > { %v1219_v10 = vpop.eup %1218  ;;  %v754_v11 = vmul.f32 1.442695, %v753_v8  ;;  %1106 = vmatmul.msk.bf16.vlgmr.msrb.gmra.mxu0 %vm607_vm2, %v639_v9 }
 0x23c   : > { %v814_v12 = vsel %vm607_vm2, %v1219_v10, 0.0 }
 0x23d   : > { %1220 = vpow2.f32 %v754_v11  ;;  %815 = vadd.xlane.f32.xlu0 %v814_v12 }
 0x240   : > { %v707_v13 = vpop.permute.xlu2 %706 }
 0x241   : > { %v712_v14 = vsel %vm643_vm3, %v707_v13, 0 }
 0x242   : > { %721 = vmatpush.bf16.msrb.mxu2 %v712_v14 }
 0x243   : > { %v1221_v15 = vpop.eup %1220 }
 0x244   : > { %v756_v16 = vsel %vm607_vm2, %v1221_v15, 0.0 }
 0x245   : > { %757 = vadd.xlane.f32.xlu1 %v756_v16 }
 0x251   : > { %822 = vrot.lane.b32.xlu0 %v705_v59, %s1342_s18  ;;  %s1344_s18 = smov 24  }
 0x25e   : > { %764 = vrot.lane.b32.xlu1 %v705_v59, %s1340_s30  ;;  %s1645_s30 = smov 8  }
 0x2a0   : > { %v697_v17 = vpop.xlane.xlu0 %696 }
 0x2a1   : > { %1222 = vrcp.f32 %v697_v17 }
 0x2a7   : > { %v1223_v18 = vpop.eup %1222 }
 0x2a8   : > { %v699_v19 = vmul.f32 %v1223_v18, %v1215_v63 }
 0x2aa   : > { %v702_v20 = vpack.c.bf16 %v699_v19, %v699_v19  ;;  %1108 = vst.msk [vmem:[%s1541_s14 + $0x8] sm:$0xff] %vm607_vm2, %v699_v19 }
 0x2ac   : > { %1109 = vmatmul.msk.bf16.vlgmr.msrb.gmra.mxu2 %vm607_vm2, %v702_v20 }
 0x2b0   : > { %v816_v21 = vpop.xlane.xlu0 %815 }
 0x2b1   : > { %1224 = vrcp.f32 %v816_v21 }
 0x2b7   : > { %v1225_v22 = vpop.eup %1224 }
 0x2b8   : > { %v818_v23 = vmul.f32 %v1225_v22, %v1219_v10  ;;  %v656_v24 = vpop.f32.mrf.mxu0  ;;  %v758_v25 = vpop.xlane.xlu1 %757 }
 0x2b9   : > { %1226 = vrcp.f32 %v758_v25 }
 0x2ba   : > { %1114 = vst.msk [vmem:[%s1541_s14 + $0x18] sm:$0xff] %vm607_vm2, %v818_v23  ;;  %v821_v31 = vpack.c.bf16 %v818_v23, %v818_v23 }
 0x2bf   : > { %v1227_v26 = vpop.eup %1226 }
 0x2c0   : > { %v760_v27 = vmul.f32 %v1227_v26, %v1221_v15  ;;  %v658_v28 = vpop.f32.mrf.mxu0 }
 0x2c2   : > { %1111 = vst.msk [vmem:[%s1541_s14 + $0x10] sm:$0xff] %vm607_vm2, %v760_v27  ;;  %v763_v34 = vpack.c.bf16 %v760_v27, %v760_v27 }
 0x2c3   : > { %v823_v29 = vpop.permute.xlu0 %822 }
 0x2c4   : > { %v828_v30 = vsel %vm643_vm3, %v823_v29, 0 }
 0x2c5   : > { %837 = vmatpush.bf16.msra.mxu2 %v828_v30 }
 0x2c8   : > { %1115 = vmatmul.msk.bf16.vlgmr.msra.gmra.mxu2 %vm607_vm2, %v821_v31 }
 0x2d0   : > { %v765_v32 = vpop.permute.xlu1 %764 }
 0x2d1   : > { %v770_v33 = vsel %vm643_vm3, %v765_v32, 0 }
 0x2d2   : > { %779 = vmatpush.bf16.msra.mxu0 %v770_v33 }
 0x2d5   : > { %1112 = vmatmul.msk.bf16.vlgmr.msra.gmra.mxu0 %vm607_vm2, %v763_v34 }
 0x32f   : > { %v723_v35 = vpop.f32.mrf.mxu2 }
 0x330   : > { %844 = vrot.lane.b32.xlu2 %v723_v35, %s1645_s30 }
 0x337   : > { %v725_v36 = vpop.f32.mrf.mxu2 }
 0x34b   : > { %v839_v37 = vpop.f32.mrf.mxu2 }
 0x34c   : > { %852 = vrot.lane.b32.xlu2 %v839_v37, %s1344_s18 }
 0x352   : > { %v781_v38 = vpop.f32.mrf.mxu0 }
 0x353   : > { %848 = vrot.lane.b32.xlu0 %v781_v38, %s1345_s29  ;;  %v841_v39 = vpop.f32.mrf.mxu2  ;;  %s931_s29 = scalar_lea.hbm %s1642_s12, %s1140_s19 }
 0x354   : > { %s934_s25 = sshll.u32 %s931_s29, 4  ;;  %s935_s25 = int_to_ptr.hbm [resolvable:$true] %s934_s25 }
 0x355   : > { %s1242_s17 = sshra.s32 %s935_s25, 4  ;;  %s1243_s17 = int_to_ptr.hbm [resolvable:$true] %s1242_s17 }
 0x356   : > { %s1244_s30 = scalar_lea.hbm %s1243_s17, 32  ;;  %p1249_p1 = scmp.lt.s32.totalorder %s1243_s17, %s1642_s12 }
 0x357   : > { %p1245_p12 = scmp.ne.s32.totalorder %s1243_s17, %s1244_s30  ;;  %p1250_p2 = scmp.lt.s32.totalorder %s1248_s2, %s1244_s30 }
 0x359   : > { %p1246_p13 = pnand %p1245_p12, %p1452_p4  ;;  %p1251_p3 = por %p1250_p2, %p1249_p1 }
 0x35a   : > { %v783_v40 = vpop.f32.mrf.mxu0 }
 0x35b   : > { %p1247_p0 = pneg %p1246_p13 }
 0x35d   : > { %p1252_p5 = pnand %p1251_p3, %p1247_p0 }
 0x38a   : > { %v845_v43 = vpop.permute.xlu2 %844 }
 0x38b   : > { %v855_v44 = vsel %vm607_vm2, %v656_v24, %v845_v43 }
 0x3a6   : > { %v853_v46 = vpop.permute.xlu2 %852 }
 0x3c5   : > { %v849_v45 = vpop.permute.xlu0 %848 }
 0x3c6   : > { %v857_v47 = vsel %vm856_vm4, %v855_v44, %v849_v45 }
 0x3c7   : > { %v859_v48 = vsel %vm858_vm5, %v857_v47, %v853_v46 }
 0x3c8   : > { %v860_v49 = vpack.c.bf16 %v859_v48, %v859_v48 }
 0x3ca   : > { %1124 = vmatmul.msk.bf16.vlgmr.msra.gmra.mxu3 %vm507_vm0, %v860_v49 }
 0x3cb   : > { %1255 = shalt.err (!%p1252_p5)
}
 0x3cc   : > { %s1346_s14 = smov 128   ;;  %s1661_s19 = smov 8   ;;  %v1211_v50 = vld [vmem:[%s1640_s10] ss:$0 sm:$0xff] }
 0x3cd   : > { %1142 = dma.vmem_to_hbm [thread:$0]  (%p1452_p4), %s933_s28, 512, %s935_s25, %s904_s16, %s1346_s14, %s1346_s14, %s1661_s19  }
 0x3ce   : > { %s1127_s27 = sshll.u32 %s1330_s24, 3  ;;  %s1073_s18 = sshll.u32 %s1538_s20, 3 }
 0x3cf   : > { %s915_s3 = scalar_lea.hbm %s1641_s11, %s1127_s27  ;;  %s458_s30 = scalar_lea.vmem [#allocation4], %s1073_s18 }
 0x3d0   : > { %s917_s29 = sshll.u32 %s458_s30, 4  ;;  %s919_s17 = sshll.u32 %s915_s3, 4  ;;  %s918_s29 = int_to_ptr.vmem [resolvable:$true] %s917_s29  ;;  %s920_s17 = int_to_ptr.hbm [resolvable:$true] %s919_s17 }
 0x3d1   : > { %s899_s24 = scalar_lea.sflag [#allocation5], %s1538_s20  ;;  %s1270_s28 = sshra.s32 %s920_s17, 4  ;;  %s1271_s28 = int_to_ptr.hbm [resolvable:$true] %s1270_s28 }
 0x3d2   : > { %s1272_s25 = scalar_lea.hbm %s1271_s28, 8  ;;  %s1276_s19 = scalar_lea.hbm %s1641_s11, 16 }
 0x3d3   : > { %p1273_p6 = scmp.ne.s32.totalorder %s1271_s28, %s1272_s25  ;;  %p1277_p10 = scmp.lt.s32.totalorder %s1271_s28, %s1641_s11 }
 0x3d4   : > { %p1278_p11 = scmp.lt.s32.totalorder %s1276_s19, %s1272_s25 }
 0x3d5   : > { %p1274_p7 = pnand %p1273_p6, %p1452_p4 }
 0x3d6   : > { %p1279_p12 = por %p1278_p11, %p1277_p10 }
 0x3d7   : > { %p1275_p9 = pneg %p1274_p7 }
 0x3d9   : > { %p1280_p13 = pnand %p1279_p12, %p1275_p9 }
 0x44d   : > { %v893_v51 = vpop.f32.mrf.mxu3 }
 0x44e   : > { %v894_v52 = vadd.f32 %v1211_v50, %v893_v51 }
 0x450   : > { %897 = vst.msk [vmem:[%s458_s30] sm:$0xff] %vm507_vm0, %v894_v52 }
 0x451   : > { %1283 = shalt.err (!%p1280_p13)
}
 0x452   : > { %1141 = dma.vmem_to_hbm [thread:$0]  (%p1452_p4), %s918_s29, 128, %s920_s17, %s899_s24  }
 0x455   : > { %v895_v53 = vpop.f32.mrf.mxu3 }
 0x456 PF: > { %p1152_p0 = scmp.ge.s32.totalorder %s1338_s26, 2  ;;  %s949_s20 = sand.u32 1, %s1318_s21  }
 0x457   : > { %s950_s0 = scalar_lea.sflag [#allocation5], %s949_s20 }
 0x458   : > { %p1146_p1 = pnand %p1152_p0, %p1459_p8 }
 0x45a   : > { %p1147_p2 = pneg %p1146_p1 }
 0x45c   : > { %1309 = dma.done.wait (%p1147_p2), %s950_s0, 128  }
 0x45d   : > { %1311 = vsyncadd (%p1147_p2), %s950_s0, 4294967168  ;;  %s960_s1 = scalar_lea.sflag [#allocation7], %s949_s20 }
 0x45e   : > { %1313 = dma.done.wait (%p1147_p2), %s960_s1, 512  }
 0x45f   : > { %1315 = vsyncadd (%p1147_p2), %s960_s1, 4294966784  ;;  %s29_s26 = sadd.s32 1, %s1338_s26   ;;  %s1662_s13 = sld [smem:[#allocation12_spill]] }
 0x460   : > { %p26_p3 = scmp.ge.s32.totalorder %s29_s26, 4   ;;  %s1663_s24 = sld [smem:[#allocation10_spill]] }
 0x461   : > { %s1664_s25 = sld [smem:[#allocation11_spill]]  ;;  %s1665_s21 = smov %s1322_s22 }
 0x462   : > { %s1666_s22 = smov %s1326_s23  ;;  %28 = sbr.rel (!%p26_p3) target bundleno = 12 (0xc), region = 129 }
 0x465   : > { %s1667_s23 = smov %s1662_s13 }
 0x467   :  { %966 = vsyncpa [#allocation5], 1 }
 0x468   :  { %968 = vsyncpa [#allocation5 + $0x1], 1 }
 0x469   :  { %969 = vsyncpa [#allocation7], 1 }
 0x46a   :  { %971 = vsyncpa [#allocation7 + $0x1], 1 }

</bundles_post_ra>
